<compile_context>
chip_gen: v5e
topology: v5e:2x2
jax: 0.10.0
libtpu: 0.0.40
codegen_flags: <defaults>
</compile_context>

<pallas_src>
import functools

import jax
import jax.numpy as jnp
from jax.experimental import pallas as pl
from jax.experimental.pallas import tpu as pltpu

_LANES = 128
_SUB = 8
_NUM_STATS = 4           # [intersection, sum_p, sum_t, sum_bce]


def _dice_bce_kernel(x_ref, t_ref, o_ref, *, n_rows, block_rows,
                     tiles_per_part, n_full_tiles):
    """One grid step: partial [inter, sum_p, sum_t, sum_bce] for one row-block.

    o_ref: f32[4, 8, 128] — resident accumulator block (one per parallel part).
    """
    p_idx = pl.program_id(0)      # parallel (TensorCore) axis
    i_idx = pl.program_id(1)      # arbitrary (reduction) axis
    tile_idx = p_idx * tiles_per_part + i_idx

    @pl.when(i_idx == 0)
    def _():
        o_ref[...] = jnp.zeros_like(o_ref)

    x = x_ref[...].astype(jnp.float32)
    t = t_ref[...].astype(jnp.float32)
    rows, lanes = x.shape

    def accumulate(x, t, valid=None):
        # Shared exp(-|x|) gives sigmoid and log(1+e) with 2 transcendentals.
        e = jnp.exp(-jnp.abs(x))                       # in (0, 1]
        one_plus_e = 1.0 + e
        inv = pl.reciprocal(one_plus_e, approx=False)  # EUP-friendly
        p = jnp.where(x >= 0, inv, e * inv)            # sigmoid(x)
        # BCE-with-logits form == -[t*log(p) + (1-t)*log(1-p)] exactly;
        # (torch's -100 clamp only differs for |x| >~ 100).
        bce = jnp.maximum(x, 0.0) - x * t + jnp.log(one_plus_e)
        if valid is not None:
            # Boolean selects (not float multiplies): NaN/Inf-safe for the
            # unspecified contents of out-of-bounds rows.
            p = jnp.where(valid, p, 0.0)
            t = jnp.where(valid, t, 0.0)
            bce = jnp.where(valid, bce, 0.0)

        def tile_sum(v):            # (rows, 128) -> (8, 128); pure VPU adds
            return jnp.sum(v.reshape(rows // _SUB, _SUB, lanes), axis=0)

        o_ref[0] += tile_sum(p * t)     # intersection
        o_ref[1] += tile_sum(p)         # sum of probabilities
        o_ref[2] += tile_sum(t)         # sum of targets
        o_ref[3] += tile_sum(bce)       # BCE sum

    # A tile is "ragged" iff some of its rows lie past n_rows (includes any
    # fully-out-of-range tiles created by rounding n_tiles up to `parts`).
    is_ragged = tile_idx >= n_full_tiles

    @pl.when(jnp.logical_not(is_ragged))
    def _():                            # fast path: no mask work at all
        accumulate(x, t)

    @pl.when(is_ragged)
    def _():                            # at most one real tile per part
        rem_rows = n_rows - tile_idx * block_rows      # may be <= 0
        row_ids = jax.lax.broadcasted_iota(jnp.int32, (rows, lanes), 0)
        accumulate(x, t, valid=row_ids < rem_rows)


def _default_num_parts():
    """1 on single-TensorCore chips (v5e/v6e); best-effort 2 on dual-TC v7x."""
    try:
        info = pltpu.get_tpu_info()
    except Exception:
        return 1
    for name in ("num_tensorcores", "tensorcores_per_chip",
                 "num_cores_per_chip", "num_cores"):
        v = getattr(info, name, None)
        if isinstance(v, int) and v > 0:
            return min(v, 2)
    return 1


def dice_bce_loss(inputs, targets, *, weight=0.5, smooth=1.0,
                  block_rows=1024, num_parts=None):
    """JAX/Pallas equivalent of DiceBCELoss.forward(inputs, targets)."""
    n_total = inputs.size
    x = jnp.reshape(inputs, (-1,))
    t = jnp.reshape(targets, (-1,))

    n_rows = n_total // _LANES
    n_main = n_rows * _LANES

    # ---- sub-128-element tail in plain JAX (no work for /128 sizes) --------
    if n_main != n_total:
        xt = x[n_main:].astype(jnp.float32)
        tt = t[n_main:].astype(jnp.float32)
        e_t = jnp.exp(-jnp.abs(xt))
        p_t = jax.nn.sigmoid(xt)
        bce_t = jnp.maximum(xt, 0.0) - xt * tt + jnp.log(1.0 + e_t)
        tail = jnp.stack([jnp.sum(p_t * tt), jnp.sum(p_t),
                          jnp.sum(tt), jnp.sum(bce_t)]).astype(jnp.float32)
    else:
        tail = jnp.zeros((_NUM_STATS,), jnp.float32)

    if n_rows == 0:
        sums = tail
    else:
        if n_main != n_total:
            # Only for element counts not divisible by 128 (rare for UNet
            # shapes).  XLA materializes this prefix slice once; the common
            # divisible case above stays fully zero-copy.
            x = x[:n_main]
            t = t[:n_main]
        x2d = x.reshape(n_rows, _LANES)
        t2d = t.reshape(n_rows, _LANES)

        # Block rows: multiple of 8 sublanes, capped at the array size.
        block_rows_eff = min(block_rows, ((n_rows + _SUB - 1) // _SUB) * _SUB)
        n_row_tiles = -(-n_rows // block_rows_eff)
        n_full_tiles = n_rows // block_rows_eff

        parts = num_parts if num_parts is not None else _default_num_parts()
        parts = max(1, min(parts, n_row_tiles))
        tiles_per_part = -(-n_row_tiles // parts)

        kernel = functools.partial(
            _dice_bce_kernel,
            n_rows=n_rows,
            block_rows=block_rows_eff,
            tiles_per_part=tiles_per_part,
            n_full_tiles=n_full_tiles,
        )

        def in_map(pi, i):
            # Clamp so tiles created by rounding up to `parts` re-read the last
            # in-bounds block (the kernel masks them to zero contribution).
            return (jnp.minimum(pi * tiles_per_part + i, n_row_tiles - 1), 0)

        in_bytes = (x2d.size * x2d.dtype.itemsize
                    + t2d.size * t2d.dtype.itemsize)
        out_bytes = parts * _NUM_STATS * _SUB * _LANES * 4

        partials = pl.pallas_call(
            kernel,
            out_shape=jax.ShapeDtypeStruct(
                (parts * _NUM_STATS, _SUB, _LANES), jnp.float32),
            grid_spec=pltpu.PrefetchScalarGridSpec(
                num_scalar_prefetch=0,
                grid=(parts, tiles_per_part),
                in_specs=[
                    pl.BlockSpec((block_rows_eff, _LANES), in_map),
                    pl.BlockSpec((block_rows_eff, _LANES), in_map),
                ],
                out_specs=pl.BlockSpec((_NUM_STATS, _SUB, _LANES),
                                       lambda pi, i: (pi, 0, 0)),
            ),
            compiler_params=pltpu.CompilerParams(
                dimension_semantics=("parallel", "arbitrary"),
                vmem_limit_bytes=32 * 1024 * 1024,
            ),
            cost_estimate=pl.CostEstimate(
                flops=16 * n_main,
                transcendentals=2 * n_main,
                bytes_accessed=in_bytes + out_bytes,
            ),
        )(x2d, t2d)

        sums = (partials.reshape(parts, _NUM_STATS, _SUB, _LANES)
                .sum(axis=(0, 2, 3)) + tail)

    # Tiny final dice/BCE combine (scalar work, plain JAX).
    intersection, sum_p, sum_t, bce_sum = sums[0], sums[1], sums[2], sums[3]
    dice_loss = 1.0 - (2.0 * intersection + smooth) / (sum_p + sum_t + smooth)
    bce_mean = bce_sum / n_total
    return weight * bce_mean + (1.0 - weight) * dice_loss


def _reference(inputs, targets, *, weight=0.5, smooth=1.0):
    # Matches torch: F.binary_cross_entropy(sigmoid(x), t) with -100 log clamp.
    p = jax.nn.sigmoid(inputs.astype(jnp.float32)).reshape(-1)
    t = targets.astype(jnp.float32).reshape(-1)
    intersection = jnp.sum(p * t)
    dice_loss = 1.0 - (2.0 * intersection + smooth) / (jnp.sum(p) + jnp.sum(t) + smooth)
    log_p = jnp.maximum(jnp.log(p), -100.0)
    log_1mp = jnp.maximum(jnp.log(1.0 - p), -100.0)
    bce = jnp.mean(-(t * log_p + (1.0 - t) * log_1mp))
    return weight * bce + (1.0 - weight) * dice_loss


if __name__ == "__main__":
    key = jax.random.PRNGKey(0)
    k1, k2, k3, k4, k5, k6 = jax.random.split(key, 6)

    # 1) Small UNet-head-like NCHW logits / binary targets (128-aligned,
    #    single block, zero-copy fast path).
    x = jax.random.normal(k1, (2, 4, 16, 16), dtype=jnp.float32)
    t = (jax.random.uniform(k2, (2, 4, 16, 16)) > 0.5).astype(jnp.float32)
    loss = jax.block_until_ready(dice_bce_loss(x, t, weight=0.5))
    ref = _reference(x, t, weight=0.5)
    assert jnp.allclose(loss, ref, atol=1e-4, rtol=1e-4), (loss, ref)

    # 2) Non-128-divisible size: exercises the in-kernel ragged row-block
    #    masking and the sub-128-element plain-JAX tail.
    x2 = jax.random.normal(k3, (1, 1, 181, 181), dtype=jnp.float32)
    t2 = (jax.random.uniform(k4, (1, 1, 181, 181)) > 0.5).astype(jnp.float32)
    loss2 = jax.block_until_ready(dice_bce_loss(x2, t2, weight=0.5))
    ref2 = _reference(x2, t2, weight=0.5)
    assert jnp.allclose(loss2, ref2, atol=1e-4, rtol=1e-4), (loss2, ref2)

    # 3) 128-aligned but multi-tile with a ragged last block (zero-copy path,
    #    interior fast path + masked last block), plus the 2-part parallel
    #    split with index_map clamping of the rounding block.
    x3 = jax.random.normal(k5, (2, 1, 1200, 128), dtype=jnp.float32)
    t3 = (jax.random.uniform(k6, (2, 1, 1200, 128)) > 0.5).astype(jnp.float32)
    loss3 = jax.block_until_ready(dice_bce_loss(x3, t3, weight=0.5, num_parts=2))
    ref3 = _reference(x3, t3, weight=0.5)
    assert jnp.allclose(loss3, ref3, atol=1e-4, rtol=1e-4), (loss3, ref3)

    print("KERNEL_OK")
</pallas_src>

<mosaic_0001>
module attributes {stable_mosaic.version = 11 : i64} {
  func.func @_dice_bce_kernel(%arg0: i32, %arg1: i32, %arg2: memref<16x128xf32, #tpu.memory_space<vmem>>, %arg3: memref<16x128xf32, #tpu.memory_space<vmem>>, %arg4: memref<4x8x128xf32, #tpu.memory_space<vmem>>) attributes {dimension_semantics = [#tpu.dimension_semantics<parallel>, #tpu.dimension_semantics<arbitrary>], iteration_bounds = array<i64: 1, 1>, scalar_prefetch = 0 : i64, scratch_operands = 0 : i64, tpu.core_type = #tpu.core_type<tc>, window_params = [{transform_indices = @transform_0, window_bounds = array<i64: 16, 128>}, {transform_indices = @transform_1, window_bounds = array<i64: 16, 128>}, {transform_indices = @transform_2, window_bounds = array<i64: 4, 8, 128>}]} {
    %c1_i32 = arith.constant 1 : i32
    %0 = arith.muli %arg0, %c1_i32 : i32
    %1 = arith.addi %0, %arg1 : i32
    %c0_i32 = arith.constant 0 : i32
    %2 = arith.cmpi eq, %arg1, %c0_i32 : i32
    %3 = arith.extui %2 : i1 to i32
    %c0_i32_0 = arith.constant 0 : i32
    %4 = arith.cmpi ne, %3, %c0_i32_0 : i32
    scf.if %4 {
      %cst = arith.constant 0.000000e+00 : f32
      %13 = vector.broadcast %cst : f32 to vector<4x8x128xf32>
      %c0_7 = arith.constant 0 : index
      %c0_8 = arith.constant 0 : index
      %c0_9 = arith.constant 0 : index
      %14 = vector.load %arg4[%c0_7, %c0_8, %c0_9] : memref<4x8x128xf32, #tpu.memory_space<vmem>>, vector<4x8x128xf32>
      tpu.vector_store %arg4[%c0_7, %c0_8, %c0_9], %13 {strides = array<i32>} : memref<4x8x128xf32, #tpu.memory_space<vmem>>, vector<4x8x128xf32>,
    } else {
    }
    %c0 = arith.constant 0 : index
    %c0_1 = arith.constant 0 : index
    %5 = vector.load %arg2[%c0, %c0_1] : memref<16x128xf32, #tpu.memory_space<vmem>>, vector<16x128xf32>
    %c0_2 = arith.constant 0 : index
    %c0_3 = arith.constant 0 : index
    %6 = vector.load %arg3[%c0_2, %c0_3] : memref<16x128xf32, #tpu.memory_space<vmem>>, vector<16x128xf32>
    %c1_i32_4 = arith.constant 1 : i32
    %7 = arith.cmpi sge, %1, %c1_i32_4 : i32
    %true = arith.constant true
    %8 = arith.xori %7, %true : i1
    %9 = arith.extui %8 : i1 to i32
    %c0_i32_5 = arith.constant 0 : i32
    %10 = arith.cmpi ne, %9, %c0_i32_5 : i32
    scf.if %10 {
      %13 = math.absf %5 : vector<16x128xf32>
      %cst = arith.constant 0.000000e+00 : f32
      %14 = vector.broadcast %cst : f32 to vector<16x128xf32>
      %15 = arith.subf %14, %13 : vector<16x128xf32>
      %16 = math.exp %15 : vector<16x128xf32>
      %cst_7 = arith.constant 1.000000e+00 : f32
      %17 = vector.broadcast %cst_7 : f32 to vector<16x128xf32>
      %18 = arith.addf %17, %16 : vector<16x128xf32>
      %19 = tpu.reciprocal %18 : vector<16x128xf32> -> vector<16x128xf32>
      %cst_8 = arith.constant 0.000000e+00 : f32
      %20 = vector.broadcast %cst_8 : f32 to vector<16x128xf32>
      %21 = arith.cmpf oge, %5, %20 : vector<16x128xf32>
      %22 = arith.mulf %16, %19 : vector<16x128xf32>
      %23 = arith.select %21, %19, %22 : vector<16x128xi1>, vector<16x128xf32>
      %cst_9 = arith.constant 0.000000e+00 : f32
      %24 = vector.broadcast %cst_9 : f32 to vector<16x128xf32>
      %25 = arith.maximumf %5, %24 : vector<16x128xf32>
      %26 = arith.mulf %5, %6 : vector<16x128xf32>
      %27 = arith.subf %25, %26 : vector<16x128xf32>
      %28 = math.log %18 : vector<16x128xf32>
      %29 = arith.addf %27, %28 : vector<16x128xf32>
      %c0_10 = arith.constant 0 : index
      %c0_11 = arith.constant 0 : index
      %c0_12 = arith.constant 0 : index
      %30 = vector.load %arg4[%c0_10, %c0_11, %c0_12] : memref<4x8x128xf32, #tpu.memory_space<vmem>>, vector<1x8x128xf32>
      %31 = vector.shape_cast %30 : vector<1x8x128xf32> to vector<8x128xf32>
      %32 = arith.mulf %23, %6 : vector<16x128xf32>
      %33 = vector.shape_cast %32 : vector<16x128xf32> to vector<2x8x128xf32>
      %cst_13 = arith.constant dense<0.000000e+00> : vector<8x128xf32>
      %34 = vector.multi_reduction <add>, %33, %cst_13 [0] : vector<2x8x128xf32> to vector<8x128xf32>
      %35 = arith.addf %31, %34 : vector<8x128xf32>
      %c0_14 = arith.constant 0 : index
      %c0_15 = arith.constant 0 : index
      %c0_16 = arith.constant 0 : index
      %36 = vector.load %arg4[%c0_14, %c0_15, %c0_16] : memref<4x8x128xf32, #tpu.memory_space<vmem>>, vector<1x8x128xf32>
      %37 = vector.shape_cast %36 : vector<1x8x128xf32> to vector<8x128xf32>
      %38 = vector.shape_cast %35 : vector<8x128xf32> to vector<1x8x128xf32>
      tpu.vector_store %arg4[%c0_14, %c0_15, %c0_16], %38 {strides = array<i32>} : memref<4x8x128xf32, #tpu.memory_space<vmem>>, vector<1x8x128xf32>,
      %c1 = arith.constant 1 : index
      %c0_17 = arith.constant 0 : index
      %c0_18 = arith.constant 0 : index
      %39 = vector.load %arg4[%c1, %c0_17, %c0_18] : memref<4x8x128xf32, #tpu.memory_space<vmem>>, vector<1x8x128xf32>
      %40 = vector.shape_cast %39 : vector<1x8x128xf32> to vector<8x128xf32>
      %41 = vector.shape_cast %23 : vector<16x128xf32> to vector<2x8x128xf32>
      %cst_19 = arith.constant dense<0.000000e+00> : vector<8x128xf32>
      %42 = vector.multi_reduction <add>, %41, %cst_19 [0] : vector<2x8x128xf32> to vector<8x128xf32>
      %43 = arith.addf %40, %42 : vector<8x128xf32>
      %c1_20 = arith.constant 1 : index
      %c0_21 = arith.constant 0 : index
      %c0_22 = arith.constant 0 : index
      %44 = vector.load %arg4[%c1_20, %c0_21, %c0_22] : memref<4x8x128xf32, #tpu.memory_space<vmem>>, vector<1x8x128xf32>
      %45 = vector.shape_cast %44 : vector<1x8x128xf32> to vector<8x128xf32>
      %46 = vector.shape_cast %43 : vector<8x128xf32> to vector<1x8x128xf32>
      tpu.vector_store %arg4[%c1_20, %c0_21, %c0_22], %46 {strides = array<i32>} : memref<4x8x128xf32, #tpu.memory_space<vmem>>, vector<1x8x128xf32>,
      %c2 = arith.constant 2 : index
      %c0_23 = arith.constant 0 : index
      %c0_24 = arith.constant 0 : index
      %47 = vector.load %arg4[%c2, %c0_23, %c0_24] : memref<4x8x128xf32, #tpu.memory_space<vmem>>, vector<1x8x128xf32>
      %48 = vector.shape_cast %47 : vector<1x8x128xf32> to vector<8x128xf32>
      %49 = vector.shape_cast %6 : vector<16x128xf32> to vector<2x8x128xf32>
      %cst_25 = arith.constant dense<0.000000e+00> : vector<8x128xf32>
      %50 = vector.multi_reduction <add>, %49, %cst_25 [0] : vector<2x8x128xf32> to vector<8x128xf32>
      %51 = arith.addf %48, %50 : vector<8x128xf32>
      %c2_26 = arith.constant 2 : index
      %c0_27 = arith.constant 0 : index
      %c0_28 = arith.constant 0 : index
      %52 = vector.load %arg4[%c2_26, %c0_27, %c0_28] : memref<4x8x128xf32, #tpu.memory_space<vmem>>, vector<1x8x128xf32>
      %53 = vector.shape_cast %52 : vector<1x8x128xf32> to vector<8x128xf32>
      %54 = vector.shape_cast %51 : vector<8x128xf32> to vector<1x8x128xf32>
      tpu.vector_store %arg4[%c2_26, %c0_27, %c0_28], %54 {strides = array<i32>} : memref<4x8x128xf32, #tpu.memory_space<vmem>>, vector<1x8x128xf32>,
      %c3 = arith.constant 3 : index
      %c0_29 = arith.constant 0 : index
      %c0_30 = arith.constant 0 : index
      %55 = vector.load %arg4[%c3, %c0_29, %c0_30] : memref<4x8x128xf32, #tpu.memory_space<vmem>>, vector<1x8x128xf32>
      %56 = vector.shape_cast %55 : vector<1x8x128xf32> to vector<8x128xf32>
      %57 = vector.shape_cast %29 : vector<16x128xf32> to vector<2x8x128xf32>
      %cst_31 = arith.constant dense<0.000000e+00> : vector<8x128xf32>
      %58 = vector.multi_reduction <add>, %57, %cst_31 [0] : vector<2x8x128xf32> to vector<8x128xf32>
      %59 = arith.addf %56, %58 : vector<8x128xf32>
      %c3_32 = arith.constant 3 : index
      %c0_33 = arith.constant 0 : index
      %c0_34 = arith.constant 0 : index
      %60 = vector.load %arg4[%c3_32, %c0_33, %c0_34] : memref<4x8x128xf32, #tpu.memory_space<vmem>>, vector<1x8x128xf32>
      %61 = vector.shape_cast %60 : vector<1x8x128xf32> to vector<8x128xf32>
      %62 = vector.shape_cast %59 : vector<8x128xf32> to vector<1x8x128xf32>
      tpu.vector_store %arg4[%c3_32, %c0_33, %c0_34], %62 {strides = array<i32>} : memref<4x8x128xf32, #tpu.memory_space<vmem>>, vector<1x8x128xf32>,
    } else {
    }
    %11 = arith.extui %7 : i1 to i32
    %c0_i32_6 = arith.constant 0 : i32
    %12 = arith.cmpi ne, %11, %c0_i32_6 : i32
    scf.if %12 {
      %c16_i32 = arith.constant 16 : i32
      %13 = arith.muli %1, %c16_i32 : i32
      %c16_i32_7 = arith.constant 16 : i32
      %14 = arith.subi %c16_i32_7, %13 : i32
      %15 = tpu.iota {dimensions = array<i32: 0>} : vector<16x128xi32>
      %16 = vector.broadcast %14 : i32 to vector<16x128xi32>
      %17 = arith.cmpi slt, %15, %16 : vector<16x128xi32>
      %18 = math.absf %5 : vector<16x128xf32>
      %cst = arith.constant 0.000000e+00 : f32
      %19 = vector.broadcast %cst : f32 to vector<16x128xf32>
      %20 = arith.subf %19, %18 : vector<16x128xf32>
      %21 = math.exp %20 : vector<16x128xf32>
      %cst_8 = arith.constant 1.000000e+00 : f32
      %22 = vector.broadcast %cst_8 : f32 to vector<16x128xf32>
      %23 = arith.addf %22, %21 : vector<16x128xf32>
      %24 = tpu.reciprocal %23 : vector<16x128xf32> -> vector<16x128xf32>
      %cst_9 = arith.constant 0.000000e+00 : f32
      %25 = vector.broadcast %cst_9 : f32 to vector<16x128xf32>
      %26 = arith.cmpf oge, %5, %25 : vector<16x128xf32>
      %27 = arith.mulf %21, %24 : vector<16x128xf32>
      %28 = arith.select %26, %24, %27 : vector<16x128xi1>, vector<16x128xf32>
      %cst_10 = arith.constant 0.000000e+00 : f32
      %29 = vector.broadcast %cst_10 : f32 to vector<16x128xf32>
      %30 = arith.maximumf %5, %29 : vector<16x128xf32>
      %31 = arith.mulf %5, %6 : vector<16x128xf32>
      %32 = arith.subf %30, %31 : vector<16x128xf32>
      %33 = math.log %23 : vector<16x128xf32>
      %34 = arith.addf %32, %33 : vector<16x128xf32>
      %cst_11 = arith.constant 0.000000e+00 : f32
      %35 = vector.broadcast %cst_11 : f32 to vector<16x128xf32>
      %36 = arith.select %17, %28, %35 : vector<16x128xi1>, vector<16x128xf32>
      %cst_12 = arith.constant 0.000000e+00 : f32
      %37 = vector.broadcast %cst_12 : f32 to vector<16x128xf32>
      %38 = arith.select %17, %6, %37 : vector<16x128xi1>, vector<16x128xf32>
      %cst_13 = arith.constant 0.000000e+00 : f32
      %39 = vector.broadcast %cst_13 : f32 to vector<16x128xf32>
      %40 = arith.select %17, %34, %39 : vector<16x128xi1>, vector<16x128xf32>
      %c0_14 = arith.constant 0 : index
      %c0_15 = arith.constant 0 : index
      %c0_16 = arith.constant 0 : index
      %41 = vector.load %arg4[%c0_14, %c0_15, %c0_16] : memref<4x8x128xf32, #tpu.memory_space<vmem>>, vector<1x8x128xf32>
      %42 = vector.shape_cast %41 : vector<1x8x128xf32> to vector<8x128xf32>
      %43 = arith.mulf %36, %38 : vector<16x128xf32>
      %44 = vector.shape_cast %43 : vector<16x128xf32> to vector<2x8x128xf32>
      %cst_17 = arith.constant dense<0.000000e+00> : vector<8x128xf32>
      %45 = vector.multi_reduction <add>, %44, %cst_17 [0] : vector<2x8x128xf32> to vector<8x128xf32>
      %46 = arith.addf %42, %45 : vector<8x128xf32>
      %c0_18 = arith.constant 0 : index
      %c0_19 = arith.constant 0 : index
      %c0_20 = arith.constant 0 : index
      %47 = vector.load %arg4[%c0_18, %c0_19, %c0_20] : memref<4x8x128xf32, #tpu.memory_space<vmem>>, vector<1x8x128xf32>
      %48 = vector.shape_cast %47 : vector<1x8x128xf32> to vector<8x128xf32>
      %49 = vector.shape_cast %46 : vector<8x128xf32> to vector<1x8x128xf32>
      tpu.vector_store %arg4[%c0_18, %c0_19, %c0_20], %49 {strides = array<i32>} : memref<4x8x128xf32, #tpu.memory_space<vmem>>, vector<1x8x128xf32>,
      %c1 = arith.constant 1 : index
      %c0_21 = arith.constant 0 : index
      %c0_22 = arith.constant 0 : index
      %50 = vector.load %arg4[%c1, %c0_21, %c0_22] : memref<4x8x128xf32, #tpu.memory_space<vmem>>, vector<1x8x128xf32>
      %51 = vector.shape_cast %50 : vector<1x8x128xf32> to vector<8x128xf32>
      %52 = vector.shape_cast %36 : vector<16x128xf32> to vector<2x8x128xf32>
      %cst_23 = arith.constant dense<0.000000e+00> : vector<8x128xf32>
      %53 = vector.multi_reduction <add>, %52, %cst_23 [0] : vector<2x8x128xf32> to vector<8x128xf32>
      %54 = arith.addf %51, %53 : vector<8x128xf32>
      %c1_24 = arith.constant 1 : index
      %c0_25 = arith.constant 0 : index
      %c0_26 = arith.constant 0 : index
      %55 = vector.load %arg4[%c1_24, %c0_25, %c0_26] : memref<4x8x128xf32, #tpu.memory_space<vmem>>, vector<1x8x128xf32>
      %56 = vector.shape_cast %55 : vector<1x8x128xf32> to vector<8x128xf32>
      %57 = vector.shape_cast %54 : vector<8x128xf32> to vector<1x8x128xf32>
      tpu.vector_store %arg4[%c1_24, %c0_25, %c0_26], %57 {strides = array<i32>} : memref<4x8x128xf32, #tpu.memory_space<vmem>>, vector<1x8x128xf32>,
      %c2 = arith.constant 2 : index
      %c0_27 = arith.constant 0 : index
      %c0_28 = arith.constant 0 : index
      %58 = vector.load %arg4[%c2, %c0_27, %c0_28] : memref<4x8x128xf32, #tpu.memory_space<vmem>>, vector<1x8x128xf32>
      %59 = vector.shape_cast %58 : vector<1x8x128xf32> to vector<8x128xf32>
      %60 = vector.shape_cast %38 : vector<16x128xf32> to vector<2x8x128xf32>
      %cst_29 = arith.constant dense<0.000000e+00> : vector<8x128xf32>
      %61 = vector.multi_reduction <add>, %60, %cst_29 [0] : vector<2x8x128xf32> to vector<8x128xf32>
      %62 = arith.addf %59, %61 : vector<8x128xf32>
      %c2_30 = arith.constant 2 : index
      %c0_31 = arith.constant 0 : index
      %c0_32 = arith.constant 0 : index
      %63 = vector.load %arg4[%c2_30, %c0_31, %c0_32] : memref<4x8x128xf32, #tpu.memory_space<vmem>>, vector<1x8x128xf32>
      %64 = vector.shape_cast %63 : vector<1x8x128xf32> to vector<8x128xf32>
      %65 = vector.shape_cast %62 : vector<8x128xf32> to vector<1x8x128xf32>
      tpu.vector_store %arg4[%c2_30, %c0_31, %c0_32], %65 {strides = array<i32>} : memref<4x8x128xf32, #tpu.memory_space<vmem>>, vector<1x8x128xf32>,
      %c3 = arith.constant 3 : index
      %c0_33 = arith.constant 0 : index
      %c0_34 = arith.constant 0 : index
      %66 = vector.load %arg4[%c3, %c0_33, %c0_34] : memref<4x8x128xf32, #tpu.memory_space<vmem>>, vector<1x8x128xf32>
      %67 = vector.shape_cast %66 : vector<1x8x128xf32> to vector<8x128xf32>
      %68 = vector.shape_cast %40 : vector<16x128xf32> to vector<2x8x128xf32>
      %cst_35 = arith.constant dense<0.000000e+00> : vector<8x128xf32>
      %69 = vector.multi_reduction <add>, %68, %cst_35 [0] : vector<2x8x128xf32> to vector<8x128xf32>
      %70 = arith.addf %67, %69 : vector<8x128xf32>
      %c3_36 = arith.constant 3 : index
      %c0_37 = arith.constant 0 : index
      %c0_38 = arith.constant 0 : index
      %71 = vector.load %arg4[%c3_36, %c0_37, %c0_38] : memref<4x8x128xf32, #tpu.memory_space<vmem>>, vector<1x8x128xf32>
      %72 = vector.shape_cast %71 : vector<1x8x128xf32> to vector<8x128xf32>
      %73 = vector.shape_cast %70 : vector<8x128xf32> to vector<1x8x128xf32>
      tpu.vector_store %arg4[%c3_36, %c0_37, %c0_38], %73 {strides = array<i32>} : memref<4x8x128xf32, #tpu.memory_space<vmem>>, vector<1x8x128xf32>,
    } else {
    }
    return
  }
  func.func @transform_0(%arg0: i32, %arg1: i32) -> (i32, i32) {
    %c1_i32 = arith.constant 1 : i32
    %0 = arith.muli %arg0, %c1_i32 : i32
    %1 = arith.addi %0, %arg1 : i32
    %c0_i32 = arith.constant 0 : i32
    %2 = arith.minsi %1, %c0_i32 : i32
    %c0_i32_0 = arith.constant 0 : i32
    %c0_i32_1 = arith.constant 0 : i32
    return %2, %c0_i32_0 : i32, i32
  }
  func.func @transform_1(%arg0: i32, %arg1: i32) -> (i32, i32) {
    %c1_i32 = arith.constant 1 : i32
    %0 = arith.muli %arg0, %c1_i32 : i32
    %1 = arith.addi %0, %arg1 : i32
    %c0_i32 = arith.constant 0 : i32
    %2 = arith.minsi %1, %c0_i32 : i32
    %c0_i32_0 = arith.constant 0 : i32
    %c0_i32_1 = arith.constant 0 : i32
    return %2, %c0_i32_0 : i32, i32
  }
  func.func @transform_2(%arg0: i32, %arg1: i32) -> (i32, i32, i32) {
    %c0_i32 = arith.constant 0 : i32
    %c0_i32_0 = arith.constant 0 : i32
    %c0_i32_1 = arith.constant 0 : i32
    return %arg0, %c0_i32, %c0_i32_0 : i32, i32, i32
  }
}

</mosaic_0001>

<bundles_post_ra>
// kernel: tpu_custom_call.1
= control target key start
LH: loop header
LB: loop body
LE: loop exit
PB: predicated region body
PF: predicated region fallthrough
CT: control target
= control target key end

     0   :  { %7 = vsyncpa [#allocation3], 0  ;;  %s430_s0 = inlined_call_operand.hbm [shape: f32[16,128], index: 0, kind: input, shape index: {}]   ;;  %s431_s1 = inlined_call_operand.hbm [shape: f32[16,128], index: 1, kind: input, shape index: {}]   ;;  %s432_s2 = inlined_call_operand.hbm [shape: f32[4,8,128], index: 2, kind: output, shape index: {}]  }
   0x1   :  { %8 = vsyncpa [#allocation6], 0 }
   0x2   :  { %9 = vsyncpa [#allocation4], 0  ;;  %s20_s11 = sshll.u32 %s430_s0, 4  ;;  %s373_s12 = smov [#allocation2]   ;;  %s21_s11 = int_to_ptr.hbm [resolvable:$true] %s20_s11 }
   0x3   :  { %s22_s13 = sshll.u32 %s373_s12, 4  ;;  %s39_s16 = sshll.u32 %s431_s1, 4  ;;  %s23_s13 = int_to_ptr.vmem [resolvable:$true] %s22_s13  ;;  %s40_s16 = int_to_ptr.hbm [resolvable:$true] %s39_s16 }
   0x4   :  { %s374_s17 = smov 128   ;;  %s375_s18 = smov 8  }
   0x5   :  { %28 = dma.hbm_to_vmem [thread:$0]  %s21_s11, 256, %s23_s13, [#allocation3], %s374_s17, %s374_s17, %s375_s18  }
   0x6   :  { %s376_s19 = smov [#allocation5]  }
   0x7   :  { %s41_s20 = sshll.u32 %s376_s19, 4  ;;  %s42_s20 = int_to_ptr.vmem [resolvable:$true] %s41_s20 }
   0x8   :  { %47 = dma.hbm_to_vmem [thread:$0]  %s40_s16, 256, %s42_s20, [#allocation6], %s374_s17, %s374_s17, %s375_s18  }
   0x9   :  { %367 = dma.done.wait [#allocation3], 256  }
   0xa   :  { %368 = vsyncadd [#allocation3], 4294967040 }
   0xb   :  { %369 = dma.done.wait [#allocation6], 256  }
   0xc   :  { %370 = vsyncadd [#allocation6], 4294967040  ;;  %v405_v0 = vld [vmem:[#allocation2] sm:$0xff]  ;;  %v407_v1 = vld [vmem:[#allocation2 + $0x8] sm:$0xff]  ;;  %s377_s0 = smov [#allocation7]   ;;  %s259_s23 = sshll.u32 %s432_s2, 4  ;;  %s260_s23 = int_to_ptr.hbm [resolvable:$true] %s259_s23 }
   0xd   :  { %v82_v2 = vand.u32 2147483647, %v405_v0  ;;  %v83_v3 = vand.u32 2147483647, %v407_v1  ;;  %v411_v8 = vld [vmem:[#allocation5] sm:$0xff]  ;;  %v76_v9 = vld [vmem:[#allocation5 + $0x8] sm:$0xff] }
   0xe   :  { %v151_v10 = vadd.f32 %v76_v9, %v411_v8  ;;  %v128_v15 = vmul.f32 %v411_v8, %v405_v0  ;;  %v126_v16 = vmax.f32 %v405_v0, 0.0  ;;  %v127_v17 = vmax.f32 %v407_v1, 0.0  ;;  %s257_s1 = sshll.u32 %s377_s0, 4  ;;  %s258_s1 = int_to_ptr.vmem [resolvable:$true] %s257_s1 }
   0xf   :  { %v84_v4 = vsub.f32 0.0, %v82_v2  ;;  %v85_v5 = vsub.f32 0.0, %v83_v3  ;;  %v129_v18 = vmul.f32 %v76_v9, %v407_v1  ;;  %vm120_vm8 = vcmp.ge.f32.partialorder %v405_v0, 0.0 }
  0x10   :  { %153 = vst [vmem:[#allocation7 + $0x10] sm:$0xff] %v151_v10  ;;  %v130_v22 = vsub.f32 %v126_v16, %v128_v15  ;;  %vm121_vm9 = vcmp.ge.f32.partialorder %v407_v1, 0.0 }
  0x11   :  { %v86_v6 = vmul.f32 1.442695, %v84_v4  ;;  %v88_v7 = vmul.f32 1.442695, %v85_v5  ;;  %v131_v23 = vsub.f32 %v127_v17, %v129_v18 }
  0x13   :  { %283 = vpow2.f32 %v86_v6 }
  0x14   :  { %285 = vpow2.f32 %v88_v7 }
  0x19   :  { %v284_v11 = vpop.eup %283 }
  0x1a   :  { %v286_v12 = vpop.eup %285  ;;  %v90_v13 = vadd.f32 1.0, %v284_v11 }
  0x1b   :  { %v91_v14 = vadd.f32 1.0, %v286_v12 }
  0x1c   :  { %287 = vrcp.f32 %v90_v13  ;;  %vm97_vm0 = vweird.f32 %v90_v13  ;;  %v101_v25 = vand.u32 2147483647, %v90_v13  ;;  %v103_v26 = vand.u32 2147483648, %v90_v13 }
  0x1d   :  { %289 = vrcp.f32 %v91_v14  ;;  %vm111_vm1 = vweird.f32 %v91_v14  ;;  %v117_v30 = vand.u32 2147483648, %v91_v14  ;;  %v115_v33 = vand.u32 2147483647, %v91_v14 }
  0x1e   :  { %291 = vlog2.f32 %v90_v13  ;;  %v104_v37 = vor.u32 1.1754944e-38, %v103_v26  ;;  %vm102_vm5 = vcmp.eq.f32.partialorder %v101_v25, 8.507059e+37 }
  0x1f   :  { %293 = vlog2.f32 %v91_v14  ;;  %v118_v41 = vor.u32 1.1754944e-38, %v117_v30  ;;  %vm116_vm7 = vcmp.eq.f32.partialorder %v115_v33, 8.507059e+37 }
  0x22   :  { %v288_v19 = vpop.eup %287 }
  0x23   :  { %v290_v20 = vpop.eup %289  ;;  %v93_v21 = vmul.f32 %v288_v19, %v90_v13  ;;  %vm98_vm2 = vweird.f32 %v288_v19 }
  0x24   :  { %v292_v24 = vpop.eup %291  ;;  %v107_v27 = vmul.f32 %v290_v20, %v91_v14  ;;  %vm112_vm3 = vweird.f32 %v290_v20  ;;  %vm99_vm4 = vmor %vm97_vm0, %vm98_vm2 }
  0x25   :  { %v294_v28 = vpop.eup %293  ;;  %v94_v29 = vsub.f32 1.0, %v93_v21  ;;  %v133_v31 = vmul.f32 0.6931472, %v292_v24  ;;  %vm113_vm6 = vmor %vm111_vm1, %vm112_vm3 }
  0x26   :  { %v108_v32 = vsub.f32 1.0, %v107_v27  ;;  %v135_v34 = vmul.f32 0.6931472, %v294_v28 }
  0x27   :  { %v95_v35 = vmul.f32 %v288_v19, %v94_v29  ;;  %v136_v36 = vadd.f32 %v133_v31, %v130_v22 }
  0x28   :  { %v109_v38 = vmul.f32 %v290_v20, %v108_v32  ;;  %v137_v39 = vadd.f32 %v135_v34, %v131_v23 }
  0x29   :  { %v96_v40 = vadd.f32 %v288_v19, %v95_v35 }
  0x2a   :  { %v110_v42 = vadd.f32 %v290_v20, %v109_v38  ;;  %v156_v43 = vadd.f32 %v137_v39, %v136_v36 }
  0x2b   :  { %v100_v44 = vsel %vm99_vm4, %v288_v19, %v96_v40 }
  0x2c   :  { %v105_v45 = vsel %vm102_vm5, %v104_v37, %v100_v44  ;;  %v114_v46 = vsel %vm113_vm6, %v290_v20, %v110_v42  ;;  %158 = vst [vmem:[#allocation7 + $0x18] sm:$0xff] %v156_v43 }
  0x2d   :  { %v119_v47 = vsel %vm116_vm7, %v118_v41, %v114_v46  ;;  %v122_v48 = vmul.f32 %v284_v11, %v105_v45 }
  0x2e   :  { %v123_v49 = vmul.f32 %v286_v12, %v119_v47 }
  0x2f   :  { %v124_v50 = vsel %vm120_vm8, %v105_v45, %v122_v48 }
  0x30   :  { %v125_v51 = vsel %vm121_vm9, %v119_v47, %v123_v49  ;;  %v139_v52 = vmul.f32 %v124_v50, %v411_v8 }
  0x31   :  { %v140_v53 = vmul.f32 %v125_v51, %v76_v9  ;;  %v146_v54 = vadd.f32 %v125_v51, %v124_v50 }
  0x33   :  { %v141_v55 = vadd.f32 %v140_v53, %v139_v52  ;;  %148 = vst [vmem:[#allocation7 + $0x8] sm:$0xff] %v146_v54 }
  0x35   :  { %143 = vst [vmem:[#allocation7] sm:$0xff] %v141_v55 }
  0x36   :  { %265 = dma.vmem_to_hbm [thread:$0]  %s258_s1, 512, %s260_s23, [#allocation4], %s374_s17, %s374_s17, %s375_s18  }
  0x37   :  { %371 = dma.done.wait [#allocation4], 512  }
  0x38   :  { %372 = vsyncadd [#allocation4], 4294966784 }
  0x39   :  { %270 = vsyncpa [#allocation3], 1 }
  0x3a   :  { %271 = vsyncpa [#allocation6], 1 }
  0x3b   :  { %272 = vsyncpa [#allocation4], 1 }

</bundles_post_ra>
